<compile_context>
chip_gen: v6e
topology: v6e:2x2x1
jax: 0.10.0
libtpu: 0.0.40
codegen_flags: <defaults>
</compile_context>

<pallas_src>
import functools

import jax
import jax.numpy as jnp
from jax.experimental import pallas as pl
from jax.experimental.pallas import tpu as pltpu


def _normalization_kernel(mean_ref, inv_std_ref, img_ref, out_ref, *, block_rows):
    # mean_ref / inv_std_ref : full (padded_R, 1) f32 columns, resident in VMEM.
    # img_ref / out_ref      : (TR, TC) tiles of the flattened (N*C, H*W) image.
    r0 = pl.multiple_of(pl.program_id(0) * block_rows, 8)
    m = mean_ref[pl.ds(r0, block_rows), :]        # (TR, 1) f32
    inv = inv_std_ref[pl.ds(r0, block_rows), :]   # (TR, 1) f32
    x = img_ref[...].astype(jnp.float32)          # compute in f32, cast on store
    out_ref[...] = ((x - m) * inv).astype(out_ref.dtype)


def _default_block_bytes():
    """Chip-aware target block size for this HBM-bound op."""
    try:
        kind = jax.devices()[0].device_kind.lower()
    except Exception:
        return 4 << 20
    if "v7" in kind:
        return 6 << 20          # 3.2 TB/s HBM: bigger blocks hide step overhead
    if "v5 lite" in kind or "v5e" in kind or "v5litepod" in kind:
        return 3 << 20          # 0.82 TB/s: 2-3 MiB already ~93% efficient
    return 4 << 20              # v6e and default


def _choose_tiles(R, L, itemsize, row_unit, target_bytes):
    """Pick (TR, TC): lane-dense, ~target_bytes per block, (8,128)-legal."""
    min_rows = min(R, row_unit)
    if L % 128 != 0 or L * itemsize * min_rows <= target_bytes:
        # Full rows. For L not a multiple of 128 this is the only legal lane
        # split; vmem_limit_bytes below is sized off the actual block, so an
        # oversized minimum slab still compiles (no silent scoped-VMEM OOM).
        TC = L
    else:
        TC = max(128, (target_bytes // (min_rows * itemsize)) // 128 * 128)
        TC = min(TC, L)
    rows_fit = max(1, target_bytes // (TC * itemsize))
    if rows_fit >= R:
        TR = R
    else:
        TR = max(row_unit, (rows_fit // row_unit) * row_unit)
        TR = min(TR, R)
    # Megacore: if the whole problem would be a single (1,1) block, split the
    # row axis so both v7x TensorCores get a block (harmless on single-TC chips).
    if TR == R and TC == L and R >= 2 * row_unit:
        TR = max(row_unit, (R // 2 // row_unit) * row_unit)
    return TR, TC


def normalization(img, mean, std, *, target_block_bytes=None):
    """img: (N, C, H, W); mean/std: (C,). Returns (img - mean[c]) / std[c]."""
    N, C, H, W = img.shape
    R, L = N * C, H * W
    dtype = img.dtype
    itemsize = jnp.dtype(dtype).itemsize
    row_unit = {4: 8, 2: 16, 1: 32}.get(itemsize, 8)   # native sublane packing

    if target_block_bytes is None:
        target_block_bytes = _default_block_bytes()

    # Flatten to a lane-dense 2D problem (free for contiguous NCHW).
    x2 = img.reshape(R, L)

    # Per-row channel stats in f32; divide folded into one reciprocal (C elems).
    mean_f32 = jnp.asarray(mean, dtype=jnp.float32).reshape(-1)
    std_f32 = jnp.asarray(std, dtype=jnp.float32).reshape(-1)
    mean_col = jnp.tile(mean_f32, N).reshape(R, 1)
    inv_std_col = jnp.tile(1.0 / std_f32, N).reshape(R, 1)

    TR, TC = _choose_tiles(R, L, itemsize, row_unit, target_block_bytes)
    grid_r, grid_c = pl.cdiv(R, TR), pl.cdiv(L, TC)

    # Pad stats to grid_r*TR rows so in-kernel pl.ds slices are always in-bounds
    # (padded rows feed padded image blocks whose writes are dropped anyway).
    padded_R = grid_r * TR
    if padded_R > R:
        pad = ((0, padded_R - R), (0, 0))
        mean_col = jnp.pad(mean_col, pad)
        inv_std_col = jnp.pad(inv_std_col, pad)

    # VMEM budget: double-buffered in/out image tiles, the resident f32 stats
    # columns (layout-padded to 128 lanes, 2 buffers each), an f32 temp tile
    # for non-f32 inputs, plus slack.
    tile_bytes = TR * TC * itemsize
    stats_bytes = 2 * 2 * (pl.cdiv(padded_R, 8) * 8) * 128 * 4
    f32_tmp = TR * TC * 4 if dtype != jnp.float32 else 0
    needed = 2 * tile_bytes + 2 * tile_bytes + stats_bytes + f32_tmp + (2 << 20)
    vmem_limit = max(int(needed), 32 << 20)

    kernel = functools.partial(_normalization_kernel, block_rows=TR)

    out2 = pl.pallas_call(
        kernel,
        out_shape=jax.ShapeDtypeStruct((R, L), dtype),
        grid=(grid_r, grid_c),
        in_specs=[
            # Stats columns: whole (padded_R, 1) array as one block with a
            # constant index_map -> DMA'd once, stays resident across the grid.
            pl.BlockSpec((padded_R, 1), lambda i, j: (0, 0)),
            pl.BlockSpec((padded_R, 1), lambda i, j: (0, 0)),
            pl.BlockSpec((TR, TC), lambda i, j: (i, j)),   # image tile
        ],
        out_specs=pl.BlockSpec((TR, TC), lambda i, j: (i, j)),
        compiler_params=pltpu.CompilerParams(
            dimension_semantics=("parallel", "parallel"),
            vmem_limit_bytes=vmem_limit,
        ),
        cost_estimate=pl.CostEstimate(
            flops=2 * R * L,
            transcendentals=0,
            bytes_accessed=2 * R * L * itemsize,
        ),
    )(mean_col, inv_std_col, x2)

    return out2.reshape(N, C, H, W)


if __name__ == "__main__":
    key = jax.random.PRNGKey(0)

    # Deterministic "ImageNet-like" per-channel stats for C=4 channels
    # (the PyTorch module views mean/std as (-1, 1, 1)).
    mean = jnp.array([0.485, 0.456, 0.406, 0.5], dtype=jnp.float32)
    std = jnp.array([0.229, 0.224, 0.225, 0.25], dtype=jnp.float32)

    # Primary small shape consistent with the module.
    img = jax.random.uniform(key, (2, 4, 16, 16), dtype=jnp.float32)
    out = jax.block_until_ready(normalization(img, mean, std))
    ref = (img - mean[None, :, None, None]) / std[None, :, None, None]
    assert out.shape == img.shape and out.dtype == img.dtype
    assert jnp.allclose(out, ref, atol=1e-5, rtol=1e-5)

    # Second shape exercising the multi-row-block (megacore) path + stats slicing.
    img2 = jax.random.uniform(jax.random.PRNGKey(1), (4, 4, 16, 16),
                              dtype=jnp.float32)
    out2 = jax.block_until_ready(normalization(img2, mean, std))
    ref2 = (img2 - mean[None, :, None, None]) / std[None, :, None, None]
    assert jnp.allclose(out2, ref2, atol=1e-5, rtol=1e-5)

    print("KERNEL_OK")
</pallas_src>

<mosaic_0001>
module attributes {stable_mosaic.version = 11 : i64} {
  func.func @_normalization_kernel(%arg0: i32, %arg1: i32, %arg2: memref<8x1xf32, #tpu.memory_space<vmem>>, %arg3: memref<8x1xf32, #tpu.memory_space<vmem>>, %arg4: memref<8x256xf32, #tpu.memory_space<vmem>>, %arg5: memref<8x256xf32, #tpu.memory_space<vmem>>) attributes {dimension_semantics = [#tpu.dimension_semantics<parallel>, #tpu.dimension_semantics<parallel>], iteration_bounds = array<i64: 1, 1>, scalar_prefetch = 0 : i64, scratch_operands = 0 : i64, tpu.core_type = #tpu.core_type<tc>, window_params = [{pipeline_mode = #tpu.pipeline_mode<synchronous>, transform_indices = @transform_0, window_bounds = array<i64: 8, 1>}, {pipeline_mode = #tpu.pipeline_mode<synchronous>, transform_indices = @transform_1, window_bounds = array<i64: 8, 1>}, {transform_indices = @transform_2, window_bounds = array<i64: 8, 256>}, {transform_indices = @transform_3, window_bounds = array<i64: 8, 256>}]} {
    %c8_i32 = arith.constant 8 : i32
    %0 = arith.muli %arg0, %c8_i32 : i32
    %1 = tpu.assume_multiple %0, 8 : i32
    %2 = arith.index_cast %1 : i32 to index
    %c0 = arith.constant 0 : index
    %3 = vector.load %arg2[%2, %c0] : memref<8x1xf32, #tpu.memory_space<vmem>>, vector<8x1xf32>
    %4 = arith.index_cast %1 : i32 to index
    %c0_0 = arith.constant 0 : index
    %5 = vector.load %arg3[%4, %c0_0] : memref<8x1xf32, #tpu.memory_space<vmem>>, vector<8x1xf32>
    %c0_1 = arith.constant 0 : index
    %c0_2 = arith.constant 0 : index
    %6 = vector.load %arg4[%c0_1, %c0_2] : memref<8x256xf32, #tpu.memory_space<vmem>>, vector<8x256xf32>
    %7 = vector.broadcast %3 : vector<8x1xf32> to vector<8x256xf32>
    %8 = arith.subf %6, %7 : vector<8x256xf32>
    %9 = vector.broadcast %5 : vector<8x1xf32> to vector<8x256xf32>
    %10 = arith.mulf %8, %9 : vector<8x256xf32>
    %c0_3 = arith.constant 0 : index
    %c0_4 = arith.constant 0 : index
    %11 = vector.load %arg5[%c0_3, %c0_4] : memref<8x256xf32, #tpu.memory_space<vmem>>, vector<8x256xf32>
    tpu.vector_store %arg5[%c0_3, %c0_4], %10 {strides = array<i32>} : memref<8x256xf32, #tpu.memory_space<vmem>>, vector<8x256xf32>,
    return
  }
  func.func @transform_0(%arg0: i32, %arg1: i32) -> (i32, i32) {
    %c0_i32 = arith.constant 0 : i32
    %c0_i32_0 = arith.constant 0 : i32
    %c0_i32_1 = arith.constant 0 : i32
    return %c0_i32, %c0_i32_0 : i32, i32
  }
  func.func @transform_1(%arg0: i32, %arg1: i32) -> (i32, i32) {
    %c0_i32 = arith.constant 0 : i32
    %c0_i32_0 = arith.constant 0 : i32
    %c0_i32_1 = arith.constant 0 : i32
    return %c0_i32, %c0_i32_0 : i32, i32
  }
  func.func @transform_2(%arg0: i32, %arg1: i32) -> (i32, i32) {
    %c0_i32 = arith.constant 0 : i32
    return %arg0, %arg1 : i32, i32
  }
  func.func @transform_3(%arg0: i32, %arg1: i32) -> (i32, i32) {
    %c0_i32 = arith.constant 0 : i32
    return %arg0, %arg1 : i32, i32
  }
}

</mosaic_0001>

<bundles_post_ra>
// kernel: tpu_custom_call.1
= control target key start
LH: loop header
LB: loop body
LE: loop exit
PB: predicated region body
PF: predicated region fallthrough
CT: control target
= control target key end

     0   :  { %v77_v1 = vmov 0   ;;  %s114_s0 = inlined_call_operand.vmem [shape: f32[8,1], index: 0, kind: input, shape index: {}]   ;;  %s115_s1 = inlined_call_operand.vmem [shape: f32[8,1], index: 1, kind: input, shape index: {}]   ;;  %s116_s2 = inlined_call_operand.vmem [shape: f32[8,256], index: 2, kind: input, shape index: {}]   ;;  %s117_s3 = inlined_call_operand.hbm [shape: f32[8,256], index: 3, kind: output, shape index: {}]  }
   0x1   :  { %v17_v0 = vld [vmem:[%s114_s0] sm:$0xff]  ;;  %54 = vset.pattern.permute.xlu0 %v77_v1 }
   0x2   :  { %8 = vsyncpa [#allocation3], 0  ;;  %24 = vperm.xlu0 %54, %v17_v0   ;;  %v19_v2 = vld [vmem:[%s115_s1] sm:$0xff]  ;;  %v21_v4 = vld [vmem:[%s116_s2 + $0x8] sm:$0xff]  ;;  %s78_s20 = smov [#allocation2]  }
   0x3   :  { %v20_v3 = vld [vmem:[%s116_s2] sm:$0xff]  ;;  %s44_s0 = sshll.u32 %s78_s20, 4  ;;  %s45_s0 = int_to_ptr.vmem [resolvable:$true] %s44_s0 }
   0x4   :  { %s55_s1 = scalar_lea.vmem %s45_s0, 256  ;;  %p60_p1 = scmp.lt.s32.totalorder %s45_s0, %s45_s0 }
   0x5   :  { %p56_p0 = scmp.ne.s32.totalorder %s45_s0, %s55_s1  ;;  %p61_p2 = scmp.lt.s32.totalorder %s55_s1, %s55_s1 }
   0x6   :  { %31 = vperm.xlu0 %54, %v19_v2  }
   0x7   :  { %p62_p3 = por %p61_p2, %p60_p1 }
   0x9   :  { %p63_p4 = pnand %p62_p3, %p56_p0 }
  0x7d   :  { %v25_v5 = vpop.permute.xlu0 %24 }
  0x7e   :  { %v27_v6 = vsub.f32 %v20_v3, %v25_v5  ;;  %v28_v7 = vsub.f32 %v21_v4, %v25_v5 }
  0x81   :  { %v32_v8 = vpop.permute.xlu0 %31 }
  0x82   :  { %v34_v9 = vmul.f32 %v32_v8, %v27_v6  ;;  %v35_v10 = vmul.f32 %v32_v8, %v28_v7 }
  0x84   :  { %36 = vst [vmem:[#allocation2] sm:$0xff] %v34_v9  ;;  %37 = vst [vmem:[#allocation2 + $0x8] sm:$0xff] %v35_v10 }
  0x85   :  { %66 = shalt.err (!%p63_p4)
}
  0x86   :  { %47 = dma.vmem_to_hbm [thread:$0]  %s45_s0, 256, %s117_s3, [#allocation3]  }
  0x87   :  { %75 = dma.done.wait [#allocation3], 256  }
  0x88   :  { %76 = vsyncadd [#allocation3], 4294967040 }
  0x89   :  { %51 = vsyncpa [#allocation3], 1 }

</bundles_post_ra>
